<compile_context>
chip_gen: v7x
topology: tpu7x:2x2x1
jax: 0.10.0
libtpu: 0.0.40
codegen_flags: <defaults>
</compile_context>

<pallas_src>
import functools
import math

import jax
import jax.numpy as jnp
from jax.experimental import pallas as pl
from jax.experimental.pallas import tpu as pltpu

F32 = jnp.float32
BF16 = jnp.bfloat16
EPS = 1e-5  # BatchNorm eps

# ----- Config (from the PyTorch module) -------------------------------------
INIT_EMB = 100      # Config.init_emb_size
GC1_EMB = 200       # Config.gc1_emb_size (last assignment wins)
EMB_DIM = 200       # Config.embedding_dim
CHANNELS = 200      # Config.channels
KSIZE = 5           # Config.kernel_size
PAD = KSIZE // 2
CONV_L = EMB_DIM    # conv length == embedding_dim

FC_K = CHANNELS * CONV_L          # 40000
FC_TK = 2048                      # k-tile for the fc weight stream
FC_KPAD = ((FC_K + FC_TK - 1) // FC_TK) * FC_TK   # 40960


def _round_up(x, m):
    return (x + m - 1) // m * m


# ----- Pallas kernel: tiled matmul with fused scale/shift + activation -------
def _matmul_ep_kernel(a_ref, b_ref, scale_ref, shift_ref, o_ref, acc_ref, *,
                      act, trans_b):
    @pl.when(pl.program_id(2) == 0)
    def _():
        acc_ref[...] = jnp.zeros_like(acc_ref)

    if trans_b:
        # b tile is (tn, tk); contract on its last dim (per-tile transpose,
        # rides the XLU under the MXU loop).
        acc_ref[...] += jax.lax.dot_general(
            a_ref[...], b_ref[...],
            dimension_numbers=(((1,), (1,)), ((), ())),
            preferred_element_type=jnp.float32)
    else:
        acc_ref[...] += jnp.dot(a_ref[...], b_ref[...],
                                preferred_element_type=jnp.float32)

    @pl.when(pl.program_id(2) == pl.num_programs(2) - 1)
    def _():
        y = acc_ref[...] * scale_ref[...] + shift_ref[...]   # f32 epilogue
        if act == "relu":
            y = jnp.maximum(y, 0.0)
        elif act == "tanh":
            y = jnp.tanh(y)
        elif act == "sigmoid":
            y = jax.nn.sigmoid(y)
        o_ref[...] = y.astype(o_ref.dtype)


def matmul_ep(a, b, scale=None, shift=None, act="none",
              tm=None, tk=None, tn=None, trans_b=False, use_bf16=True):
    """out = act((a @ b[.T]) * scale + shift), scale/shift broadcast over rows.

    bf16 operands, f32 accumulation.  Fixed dims use full-dimension blocks
    (no operand padding); only ragged M is padded.
    """
    M, K = a.shape
    if trans_b:
        N, Kb = b.shape
    else:
        Kb, N = b.shape
    assert K == Kb, (a.shape, b.shape)

    cdt = BF16 if use_bf16 else F32
    sub = 16 if use_bf16 else 8

    if tk is None:
        tk = K            # full contraction dim (100 / 200 / n_ent)
    if tn is None:
        tn = N            # full output dim (200 / n_ent)
    if tm is None:
        tm = min(M, 512)

    # Only M may need padding (rows of a / output); everything else is exact.
    if tm >= M:
        tm, Mp = M, M
        a_p = a
    else:
        tm = _round_up(tm, sub)
        Mp = _round_up(M, tm)
        a_p = a if Mp == M else jnp.pad(a, ((0, Mp - M), (0, 0)))

    assert K % tk == 0, (K, tk)
    assert N % tn == 0, (N, tn)
    if tk < K:
        assert tk % 128 == 0, tk       # lane-dim tile must be 128-aligned
    if tn < N:
        assert tn % 128 == 0, tn

    a_p = a_p.astype(cdt)
    b_c = b.astype(cdt)
    scale = jnp.ones((N,), F32) if scale is None else scale.astype(F32)
    shift = jnp.zeros((N,), F32) if shift is None else shift.astype(F32)
    scale2 = scale.reshape(1, N)
    shift2 = shift.reshape(1, N)

    if trans_b:
        b_spec = pl.BlockSpec((tn, tk), lambda i, j, k: (j, k))
    else:
        b_spec = pl.BlockSpec((tk, tn), lambda i, j, k: (k, j))

    grid = (Mp // tm, N // tn, K // tk)
    out = pl.pallas_call(
        functools.partial(_matmul_ep_kernel, act=act, trans_b=trans_b),
        out_shape=jax.ShapeDtypeStruct((Mp, N), F32),
        grid_spec=pltpu.PrefetchScalarGridSpec(
            num_scalar_prefetch=0,
            grid=grid,
            in_specs=[
                pl.BlockSpec((tm, tk), lambda i, j, k: (i, k)),
                b_spec,
                pl.BlockSpec((1, tn), lambda i, j, k: (0, j)),
                pl.BlockSpec((1, tn), lambda i, j, k: (0, j)),
            ],
            out_specs=pl.BlockSpec((tm, tn), lambda i, j, k: (i, j)),
            scratch_shapes=[pltpu.VMEM((tm, tn), jnp.float32)],
        ),
        compiler_params=pltpu.CompilerParams(
            dimension_semantics=("parallel", "parallel", "arbitrary")
        ),
    )(a_p, b_c, scale2, shift2)
    return out if Mp == M else out[:M]


# ----- Pallas kernel: direct Conv1d(2->C, k=5) + bn1 + relu (VPU) ------------
def _conv_bn_relu_kernel(x_ref, w_ref, scale_ref, shift_ref, o_ref):
    # x_ref: (L+2*PAD, 2)   [batch dim squeezed]
    # w_ref: (2*KSIZE, C), rows ordered (ic, tap)
    # o_ref: (L, C)
    L = o_ref.shape[0]
    x = x_ref[...]                    # (L+4, 2) f32, tiny
    w = w_ref[...]                    # (10, C)
    acc = jnp.zeros(o_ref.shape, jnp.float32)
    for ic in range(2):
        for t in range(KSIZE):
            xi = x[t:t + L, ic:ic + 1]                 # (L, 1)  sublane column
            wv = w[ic * KSIZE + t:ic * KSIZE + t + 1]  # (1, C)  lane row
            acc = acc + xi * wv                        # broadcast FMA on VPU
    y = acc * scale_ref[...] + shift_ref[...]
    o_ref[...] = jnp.maximum(y, 0.0)


def conv_bn_relu(x_nlc_pad, w_mat, scale, shift):
    """x_nlc_pad: (B, L+2*PAD, 2) bn0-normalized, zero-padded along L.
    Returns (B, L, C) = relu(bn1(conv1d(x))) with C lane-dense."""
    B, Lp2, _ = x_nlc_pad.shape
    L = Lp2 - 2 * PAD
    C = w_mat.shape[1]
    return pl.pallas_call(
        _conv_bn_relu_kernel,
        out_shape=jax.ShapeDtypeStruct((B, L, C), F32),
        grid_spec=pltpu.PrefetchScalarGridSpec(
            num_scalar_prefetch=0,
            grid=(B,),
            in_specs=[
                pl.BlockSpec((None, Lp2, 2), lambda b: (b, 0, 0)),
                pl.BlockSpec((2 * KSIZE, C), lambda b: (0, 0)),
                pl.BlockSpec((1, C), lambda b: (0, 0)),
                pl.BlockSpec((1, C), lambda b: (0, 0)),
            ],
            out_specs=pl.BlockSpec((None, L, C), lambda b: (b, 0, 0)),
        ),
        compiler_params=pltpu.CompilerParams(
            dimension_semantics=("parallel",)
        ),
    )(x_nlc_pad.astype(F32), w_mat.astype(F32),
      scale.reshape(1, C).astype(F32), shift.reshape(1, C).astype(F32))


# ----- parameter construction (deterministic) --------------------------------
def make_params(key, num_entities, num_relations):
    ks = list(jax.random.split(key, 16))
    p = {}
    p["emb_e"] = jax.random.normal(ks[0], (num_entities, INIT_EMB), F32) * 0.1
    p["emb_e"] = p["emb_e"].at[0].set(0.0)                       # padding_idx=0
    p["emb_rel"] = jax.random.normal(ks[1], (num_relations, EMB_DIM), F32) * 0.1
    p["emb_rel"] = p["emb_rel"].at[0].set(0.0)                   # padding_idx=0

    # GraphConvolution 1: in=100, out=200
    p["gc1_w"] = jax.random.normal(ks[2], (INIT_EMB, GC1_EMB), F32) * (1.0 / math.sqrt(GC1_EMB))
    p["gc1_b"] = jax.random.normal(ks[3], (GC1_EMB,), F32) * 0.01
    p["gc1_alpha"] = jax.random.normal(ks[4], (num_relations + 1, 1), F32) * 0.1
    p["gc1_alpha"] = p["gc1_alpha"].at[0].set(0.0)               # padding_idx=0
    # GraphConvolution 2: in=200, out=200
    p["gc2_w"] = jax.random.normal(ks[5], (GC1_EMB, EMB_DIM), F32) * (1.0 / math.sqrt(EMB_DIM))
    p["gc2_b"] = jax.random.normal(ks[6], (EMB_DIM,), F32) * 0.01
    p["gc2_alpha"] = jax.random.normal(ks[7], (num_relations + 1, 1), F32) * 0.1
    p["gc2_alpha"] = p["gc2_alpha"].at[0].set(0.0)

    # Conv1d(2 -> 200, k=5)
    p["conv_w"] = jax.random.normal(ks[8], (CHANNELS, 2, KSIZE), F32) * 0.1
    p["conv_b"] = jax.random.normal(ks[9], (CHANNELS,), F32) * 0.01
    # fc: Linear(200*200 -> 200), stored (in, out) with in-index = c*L + l
    # (PyTorch flatten order of (B, C, L)).
    p["fc_w"] = jax.random.normal(ks[10], (FC_K, EMB_DIM), F32) * 0.01
    p["fc_b"] = jax.random.normal(ks[11], (EMB_DIM,), F32) * 0.01

    # BatchNorms (eval running stats): bn0(2), bn1(200), bn2(200), bn3(200), bn4(200)
    def bn(kk, n):
        g = 1.0 + 0.05 * jax.random.normal(kk, (n,), F32)
        b = 0.05 * jax.random.normal(jax.random.fold_in(kk, 1), (n,), F32)
        return dict(gamma=g, beta=b, mean=jnp.zeros((n,), F32), var=jnp.ones((n,), F32))

    p["bn0"] = bn(ks[12], 2)
    p["bn1"] = bn(ks[13], CHANNELS)
    p["bn2"] = bn(ks[14], EMB_DIM)
    p["bn3"] = bn(jax.random.fold_in(ks[15], 3), GC1_EMB)
    p["bn4"] = bn(jax.random.fold_in(ks[15], 4), EMB_DIM)
    return p


def prepare_params(p):
    """One-time derived layouts (done outside the per-call hot path)."""
    q = dict(p)
    # Conv weight as (2*K, C): row (ic, tap), out-channel lane-dense.
    q["conv_w_mat"] = jnp.transpose(p["conv_w"], (1, 2, 0)).reshape(2 * KSIZE, CHANNELS)
    # fc weight permuted to the (l, c) flatten order produced by our (B, L, C)
    # conv output, and zero-padded once along K to a multiple of FC_TK.
    w_lc = p["fc_w"].reshape(CHANNELS, CONV_L, EMB_DIM).transpose(1, 0, 2)
    w_lc = w_lc.reshape(CONV_L * CHANNELS, EMB_DIM)
    q["fc_w_lc_pad"] = jnp.pad(w_lc, ((0, FC_KPAD - FC_K), (0, 0)))
    return q


def _bn_scale_shift(bn, extra_bias=None):
    s = bn["gamma"] / jnp.sqrt(bn["var"] + EPS)
    base = -bn["mean"] if extra_bias is None else (extra_bias - bn["mean"])
    return s, base * s + bn["beta"]


# ----- SACN forward -----------------------------------------------------------
def sacn_forward(params, e1, rel, X, A):
    edge_index, edge_type, n_ent = A

    # --- dense adjacency: sparse_coo(indices, alpha) + its transpose ---------
    # TODO(synk): edge-list segment-sum Pallas kernel for realistic n_ent.
    def dense_adj(alpha_emb):
        alp = alpha_emb[edge_type, 0]                              # (E,)
        Ad = jnp.zeros((n_ent, n_ent), F32).at[edge_index[0], edge_index[1]].add(alp)
        return Ad + Ad.T

    A1 = dense_adj(params["gc1_alpha"])
    A2 = dense_adj(params["gc2_alpha"])

    # --- emb_e lookup + GCN layer 1 (support matmul, A@support, bn3, tanh) ---
    emb_initial = params["emb_e"][X]                               # (N, 100)
    support1 = matmul_ep(emb_initial, params["gc1_w"])             # (N, 200)
    s3, sh3 = _bn_scale_shift(params["bn3"], params["gc1_b"])
    x = matmul_ep(A1, support1, scale=s3, shift=sh3, act="tanh")   # (N, 200)
    # dropout: identity in eval mode

    # --- GCN layer 2 (+ bn4, tanh) -> e1_embedded_all -------------------------
    support2 = matmul_ep(x, params["gc2_w"])                       # (N, 200)
    s4, sh4 = _bn_scale_shift(params["bn4"], params["gc2_b"])
    e1_embedded_all = matmul_ep(A2, support2, scale=s4, shift=sh4, act="tanh")  # (N, 200)

    # --- gather + stack, bn0 (tiny glue, wrapper) ------------------------------
    e1_embedded = e1_embedded_all[e1[:, 0]]                        # (B, 200)
    rel_embedded = params["emb_rel"][rel[:, 0]]                    # (B, 200)
    stacked = jnp.stack([e1_embedded, rel_embedded], axis=2)       # (B, L, 2)
    s0, sh0 = _bn_scale_shift(params["bn0"])
    x0 = stacked * s0[None, None, :] + sh0[None, None, :]          # bn0
    x0 = jnp.pad(x0, ((0, 0), (PAD, PAD), (0, 0)))                 # (B, L+4, 2)

    # --- direct VPU conv + bn1 + bias + relu (fused, no im2col) ---------------
    s1, sh1 = _bn_scale_shift(params["bn1"], params["conv_b"])
    conv_out = conv_bn_relu(x0, params["conv_w_mat"], s1, sh1)     # (B, L, C)

    # --- fc + bn2 + relu (fused); weight pre-permuted to (l,c) order ----------
    B = conv_out.shape[0]
    xf = conv_out.reshape(B, CONV_L * CHANNELS)                    # (B, 40000)
    xf = jnp.pad(xf, ((0, 0), (0, FC_KPAD - FC_K)))                # (B, 40960) tiny pad
    s2, sh2 = _bn_scale_shift(params["bn2"], params["fc_b"])
    # tm = B (no padded-M waste), tk = 2048 (long k stream), tn = 200 (full;
    # N=200 cannot legally split 100/100 — v7x fc runs on one core, noted).
    x = matmul_ep(xf, params["fc_w_lc_pad"], scale=s2, shift=sh2,
                  act="relu", tk=FC_TK)                            # (B, 200)

    # --- score against all entities + sigmoid (fused, no explicit .T) ---------
    pred = matmul_ep(x, e1_embedded_all, trans_b=True, act="sigmoid")  # (B, N)
    return pred


# ----- main -------------------------------------------------------------------
if __name__ == "__main__":
    num_entities = 32
    num_relations = 6
    num_edges = 40
    batch = 8

    key = jax.random.PRNGKey(0)
    k_par, k_e1, k_rel, k_ei, k_et = jax.random.split(key, 5)

    params = prepare_params(make_params(k_par, num_entities, num_relations))

    X = jnp.arange(num_entities, dtype=jnp.int32)                               # entity ids
    edge_index = jax.random.randint(k_ei, (2, num_edges), 0, num_entities, jnp.int32)
    edge_type = jax.random.randint(k_et, (num_edges,), 1, num_relations + 1, jnp.int32)
    A = (edge_index, edge_type, num_entities)
    e1 = jax.random.randint(k_e1, (batch, 1), 0, num_entities, jnp.int32)
    rel = jax.random.randint(k_rel, (batch, 1), 0, num_relations, jnp.int32)

    pred = sacn_forward(params, e1, rel, X, A)
    pred = jax.block_until_ready(pred)

    assert pred.shape == (batch, num_entities), pred.shape
    assert bool(jnp.all(jnp.isfinite(pred)))
    assert bool(jnp.all((pred >= 0.0) & (pred <= 1.0)))
    print("KERNEL_OK")
</pallas_src>

<mosaic_0001>
module attributes {stable_mosaic.version = 11 : i64} {
  func.func @_matmul_ep_kernel(%arg0: i32, %arg1: i32, %arg2: i32, %arg3: memref<32x100xbf16, #tpu.memory_space<vmem>>, %arg4: memref<100x200xbf16, #tpu.memory_space<vmem>>, %arg5: memref<1x200xf32, #tpu.memory_space<vmem>>, %arg6: memref<1x200xf32, #tpu.memory_space<vmem>>, %arg7: memref<32x200xf32, #tpu.memory_space<vmem>>, %arg8: memref<32x200xf32, #tpu.memory_space<vmem>>) attributes {dimension_semantics = [#tpu.dimension_semantics<parallel>, #tpu.dimension_semantics<parallel>, #tpu.dimension_semantics<arbitrary>], iteration_bounds = array<i64: 1, 1, 1>, scalar_prefetch = 0 : i64, scratch_operands = 1 : i64, tpu.core_type = #tpu.core_type<tc>, window_params = [{transform_indices = @transform_0, window_bounds = array<i64: 32, 100>}, {transform_indices = @transform_1, window_bounds = array<i64: 100, 200>}, {transform_indices = @transform_2, window_bounds = array<i64: 1, 200>}, {transform_indices = @transform_3, window_bounds = array<i64: 1, 200>}, {transform_indices = @transform_4, window_bounds = array<i64: 32, 200>}]} {
    %c0_i32 = arith.constant 0 : i32
    %0 = arith.cmpi eq, %arg2, %c0_i32 : i32
    %1 = arith.extui %0 : i1 to i32
    %c0_i32_0 = arith.constant 0 : i32
    %2 = arith.cmpi ne, %1, %c0_i32_0 : i32
    scf.if %2 {
      %cst_10 = arith.constant 0.000000e+00 : f32
      %12 = vector.broadcast %cst_10 : f32 to vector<32x200xf32>
      %c0_11 = arith.constant 0 : index
      %c0_12 = arith.constant 0 : index
      %13 = vector.load %arg8[%c0_11, %c0_12] : memref<32x200xf32, #tpu.memory_space<vmem>>, vector<32x200xf32>
      tpu.vector_store %arg8[%c0_11, %c0_12], %12 {strides = array<i32>} : memref<32x200xf32, #tpu.memory_space<vmem>>, vector<32x200xf32>,
    } else {
    }
    %c0 = arith.constant 0 : index
    %c0_1 = arith.constant 0 : index
    %3 = vector.load %arg8[%c0, %c0_1] : memref<32x200xf32, #tpu.memory_space<vmem>>, vector<32x200xf32>
    %c0_2 = arith.constant 0 : index
    %c0_3 = arith.constant 0 : index
    %4 = vector.load %arg3[%c0_2, %c0_3] : memref<32x100xbf16, #tpu.memory_space<vmem>>, vector<32x100xbf16>
    %c0_4 = arith.constant 0 : index
    %c0_5 = arith.constant 0 : index
    %5 = vector.load %arg4[%c0_4, %c0_5] : memref<100x200xbf16, #tpu.memory_space<vmem>>, vector<100x200xbf16>
    %cst = arith.constant dense<0.000000e+00> : vector<32x200xf32>
    %6 = tpu.matmul %4, %5, %cst {dimension_numbers = #tpu.dot_dimension_numbers<[1], [0], [0], [1], [0, 0, 1, 1], [], []>} : vector<32x100xbf16>, vector<100x200xbf16>, vector<32x200xf32> -> vector<32x200xf32>
    %7 = arith.addf %3, %6 : vector<32x200xf32>
    %c0_6 = arith.constant 0 : index
    %c0_7 = arith.constant 0 : index
    %8 = vector.load %arg8[%c0_6, %c0_7] : memref<32x200xf32, #tpu.memory_space<vmem>>, vector<32x200xf32>
    tpu.vector_store %arg8[%c0_6, %c0_7], %7 {strides = array<i32>} : memref<32x200xf32, #tpu.memory_space<vmem>>, vector<32x200xf32>,
    %c0_i32_8 = arith.constant 0 : i32
    %9 = arith.cmpi eq, %arg2, %c0_i32_8 : i32
    %10 = arith.extui %9 : i1 to i32
    %c0_i32_9 = arith.constant 0 : i32
    %11 = arith.cmpi ne, %10, %c0_i32_9 : i32
    scf.if %11 {
      %c0_10 = arith.constant 0 : index
      %c0_11 = arith.constant 0 : index
      %12 = vector.load %arg8[%c0_10, %c0_11] : memref<32x200xf32, #tpu.memory_space<vmem>>, vector<32x200xf32>
      %c0_12 = arith.constant 0 : index
      %c0_13 = arith.constant 0 : index
      %13 = vector.load %arg5[%c0_12, %c0_13] : memref<1x200xf32, #tpu.memory_space<vmem>>, vector<1x200xf32>
      %14 = vector.broadcast %13 : vector<1x200xf32> to vector<32x200xf32>
      %15 = arith.mulf %12, %14 : vector<32x200xf32>
      %c0_14 = arith.constant 0 : index
      %c0_15 = arith.constant 0 : index
      %16 = vector.load %arg6[%c0_14, %c0_15] : memref<1x200xf32, #tpu.memory_space<vmem>>, vector<1x200xf32>
      %17 = vector.broadcast %16 : vector<1x200xf32> to vector<32x200xf32>
      %18 = arith.addf %15, %17 : vector<32x200xf32>
      %c0_16 = arith.constant 0 : index
      %c0_17 = arith.constant 0 : index
      %19 = vector.load %arg7[%c0_16, %c0_17] : memref<32x200xf32, #tpu.memory_space<vmem>>, vector<32x200xf32>
      tpu.vector_store %arg7[%c0_16, %c0_17], %18 {strides = array<i32>} : memref<32x200xf32, #tpu.memory_space<vmem>>, vector<32x200xf32>,
    } else {
    }
    return
  }
  func.func @transform_0(%arg0: i32, %arg1: i32, %arg2: i32) -> (i32, i32) {
    %c0_i32 = arith.constant 0 : i32
    return %arg0, %arg2 : i32, i32
  }
  func.func @transform_1(%arg0: i32, %arg1: i32, %arg2: i32) -> (i32, i32) {
    %c0_i32 = arith.constant 0 : i32
    return %arg2, %arg1 : i32, i32
  }
  func.func @transform_2(%arg0: i32, %arg1: i32, %arg2: i32) -> (i32, i32) {
    %c0_i32 = arith.constant 0 : i32
    %c0_i32_0 = arith.constant 0 : i32
    return %c0_i32, %arg1 : i32, i32
  }
  func.func @transform_3(%arg0: i32, %arg1: i32, %arg2: i32) -> (i32, i32) {
    %c0_i32 = arith.constant 0 : i32
    %c0_i32_0 = arith.constant 0 : i32
    return %c0_i32, %arg1 : i32, i32
  }
  func.func @transform_4(%arg0: i32, %arg1: i32, %arg2: i32) -> (i32, i32) {
    %c0_i32 = arith.constant 0 : i32
    return %arg0, %arg1 : i32, i32
  }
}

</mosaic_0001>

<bundles_post_ra>
// kernel: tpu_custom_call.1
= control target key start
LH: loop header
LB: loop body
LE: loop exit
PB: predicated region body
PF: predicated region fallthrough
CT: control target
= control target key end

     0   :  { %v375_v2 = vmov 0   ;;  %s480_s0 = inlined_call_operand.vmem [shape: bf16[32,100], index: 0, kind: input, shape index: {}]   ;;  %s481_s1 = inlined_call_operand.vmem [shape: bf16[100,200], index: 1, kind: input, shape index: {}]   ;;  %s482_s2 = inlined_call_operand.vmem [shape: f32[1,200], index: 2, kind: input, shape index: {}]   ;;  %s483_s3 = inlined_call_operand.vmem [shape: f32[1,200], index: 3, kind: input, shape index: {}]   ;;  %s484_s4 = inlined_call_operand.hbm [shape: f32[32,200], index: 4, kind: output, shape index: {}]  }
   0x1   :  { %v329_v0 = vld [vmem:[%s481_s1 + $0x4] ss:$8 sps:$4 sm:$0xff]   ;;  %v331_v1 = vld [vmem:[%s481_s1] ss:$8 sps:$4 sm:$0xff]   ;;  %178 = vmatprep.mubr.bf16.mxu0 %v375_v2  ;;  %188 = vmatprep.mubr.bf16.mxu1 %v375_v2  ;;  %v332_v3 = vld [vmem:[%s481_s1 + $0x14] ss:$8 sps:$4 sm:$0xff]  }
   0x2   :  { %146 = vmatprep.subr.bf16.mxu0 %v329_v0  ;;  %310 = vmatprep.subr.bf16.mxu1 %v329_v0  ;;  %v334_v4 = vld [vmem:[%s481_s1 + $0x10] ss:$8 sps:$4 sm:$0xff]   ;;  %v335_v5 = vld [vmem:[%s481_s1 + $0x24] ss:$8 sps:$4 sm:$0xff]   ;;  %v337_v6 = vld [vmem:[%s481_s1 + $0x20] ss:$8 sps:$4 sm:$0xff]  }
   0x3   :  { %147 = vmatpush1.bf16.msra.mxu0 %v331_v1  ;;  %317 = vmatpush1.bf16.msra.mxu1 %v331_v1  ;;  %v338_v7 = vld [vmem:[%s481_s1 + $0x34] ss:$8 sps:$4 sm:$0xff]  }
   0x4   :  { %148 = vmatprep.subr.bf16.mxu0 %v332_v3  ;;  %311 = vmatprep.subr.bf16.mxu1 %v332_v3 }
   0x7   :  { %149 = vmatpush1.bf16.msra.mxu0 %v334_v4  ;;  %318 = vmatpush1.bf16.msra.mxu1 %v334_v4 }
   0x8   :  { %150 = vmatprep.subr.bf16.mxu0 %v335_v5  ;;  %312 = vmatprep.subr.bf16.mxu1 %v335_v5 }
   0x9   :  { %9 = vsyncpa [#allocation4], 0  ;;  %v340_v8 = vld [vmem:[%s481_s1 + $0x30] ss:$8 sps:$4 sm:$0xff]   ;;  %v341_v9 = vld [vmem:[%s481_s1 + $0x44] ss:$8 sps:$4 sm:$0xff]   ;;  %v229_v20 = vlaneseq }
   0xa   :  { %v343_v10 = vld [vmem:[%s481_s1 + $0x40] ss:$8 sps:$4 sm:$0xff]   ;;  %v344_v11 = vld [vmem:[%s481_s1 + $0x54] ss:$8 sps:$4 sm:$0xff]   ;;  %v346_v13 = vld [vmem:[%s481_s1 + $0x50] ss:$8 sps:$4 sm:$0xff]  }
   0xb   :  { %151 = vmatpush1.bf16.msra.mxu0 %v337_v6  ;;  %319 = vmatpush1.bf16.msra.mxu1 %v337_v6  ;;  %v56_v12 = vld [vmem:[%s481_s1 + $0x60] sm:$0x33]  ;;  %vm139_vm0 = vcmask 1041408   ;;  %v350_v18 = vld [vmem:[%s480_s0 + $0x8] sm:$0xff]   ;;  %vm132_vm1 = vcmask 818176   ;;  %vm24_vm2 = vcmask 588800  }
   0xc   :  { %152 = vmatprep.subr.bf16.mxu0 %v338_v7  ;;  %313 = vmatprep.subr.bf16.mxu1 %v338_v7  ;;  %v306_v14 = vcombine.high %v56_v12, %v56_v12  ;;  %v305_v15 = vcombine.low %v56_v12, %v56_v12  ;;  %v349_v17 = vld [vmem:[%s480_s0] sm:$0xff]   ;;  %v376_v19 = vmov 0.0   ;;  %v230_v21 = vshrl.u32 %v229_v20, 7 }
   0xd   :  { %25 = vst.msk [vmem:[#allocation2 + $0x8] sm:$0xff] %vm24_vm2, %v376_v19  ;;  %27 = vst.msk [vmem:[#allocation2 + $0x18] sm:$0xff] %vm24_vm2, %v376_v19  ;;  %v227_v23 = vld [vmem:[%s482_s2] sm:$0x3]  ;;  %s377_s2 = smov [#allocation3]  }
   0xe   :  { %v141_v16 = vsel %vm139_vm0, %v305_v15, 0  ;;  %29 = vst.msk [vmem:[#allocation2 + $0x28] sm:$0xff] %vm24_vm2, %v376_v19  ;;  %31 = vst.msk [vmem:[#allocation2 + $0x38] sm:$0xff] %vm24_vm2, %v376_v19  ;;  %v231_v22 = vsub.s32 0, %v230_v21  ;;  %v247_v24 = vld [vmem:[%s483_s3] sm:$0x3] }
   0xf   :  { %153 = vmatpush1.bf16.msra.mxu0 %v340_v8  ;;  %320 = vmatpush1.bf16.msra.mxu1 %v340_v8  ;;  %v235_v43 = vsub.s32 1, %v230_v21  ;;  %s280_s3 = sshll.u32 %s377_s2, 4  ;;  %s281_s3 = int_to_ptr.vmem [resolvable:$true] %s280_s3 }
  0x10   :  { %154 = vmatprep.subr.bf16.mxu0 %v341_v9  ;;  %314 = vmatprep.subr.bf16.mxu1 %v341_v9  ;;  %v232_v25 = vrot.slane %v227_v23, %v231_v22  ;;  %v252_v34 = vrot.slane %v247_v24, %v231_v22  ;;  %s351_s21 = scalar_lea.vmem %s281_s3, 1024  ;;  %p356_p1 = scmp.lt.s32.totalorder %s281_s3, %s281_s3 }
  0x11   :  { %v236_v52 = vrot.slane %v227_v23, %v235_v43  ;;  %v256_v53 = vrot.slane %v247_v24, %v235_v43  ;;  %p352_p0 = scmp.ne.s32.totalorder %s281_s3, %s351_s21  ;;  %p357_p2 = scmp.lt.s32.totalorder %s351_s21, %s351_s21 }
  0x13   :  { %155 = vmatpush1.bf16.msra.mxu0 %v343_v10  ;;  %321 = vmatpush1.bf16.msra.mxu1 %v343_v10  ;;  %p358_p3 = por %p357_p2, %p356_p1 }
  0x14   :  { %156 = vmatprep.subr.bf16.mxu0 %v344_v11  ;;  %315 = vmatprep.subr.bf16.mxu1 %v344_v11  ;;  %v33_v26 = vld [vmem:[#allocation2 + $0x8] sm:$0xff]  ;;  %v35_v32 = vld [vmem:[#allocation2 + $0x18] sm:$0xff] }
  0x15   :  { %v37_v27 = vld [vmem:[#allocation2 + $0x28] sm:$0xff]  ;;  %v39_v33 = vld [vmem:[#allocation2 + $0x38] sm:$0xff]  ;;  %p359_p4 = pnand %p358_p3, %p352_p0 }
  0x17   :  { %157 = vmatpush1.bf16.msra.mxu0 %v346_v13  ;;  %322 = vmatpush1.bf16.msra.mxu1 %v346_v13 }
  0x18   :  { %307 = vmatprep.subr.msk.bf16.mxu0 %vm139_vm0, %v306_v14  ;;  %316 = vmatprep.subr.msk.bf16.mxu1 %vm139_vm0, %v306_v14 }
  0x1b   :  { %159 = vmatpush1.bf16.msra.mxu0 %v141_v16  ;;  %323 = vmatpush1.bf16.msra.mxu1 %v141_v16 }
  0x1e   :  { %308 = vmatmul.mubr.msk.bf16.vlgmr.msra.gmra.mrb[0].mxu0 %vm132_vm1, %v349_v17  ;;  %309 = vmatmul.mubr.msk.bf16.vlgmr.msra.gmra.mrb[0].mxu1 %vm132_vm1, %v350_v18 }
  0xf1   :  { %v180_v28 = vpop.f32.mrb[0].mxu0  ;;  %v190_v29 = vpop.f32.mrb[0].mxu1 }
  0xf2   :  { %v182_v30 = vpop.f32.mrb[1].mxu0  ;;  %v192_v31 = vpop.f32.mrb[1].mxu1  ;;  %v239_v39 = vmul.f32 %v232_v25, %v180_v28  ;;  %v243_v40 = vmul.f32 %v232_v25, %v190_v29 }
  0xf3   :  { %v200_v35 = vadd.f32 %v182_v30, %v33_v26  ;;  %v204_v36 = vadd.f32 %v192_v31, %v37_v27  ;;  %v184_v37 = vpop.f32.mrb[2].mxu0  ;;  %v194_v38 = vpop.f32.mrb[2].mxu1 }
  0xf4   :  { %v186_v41 = vpop.f32.mrb[3].mxu0  ;;  %v196_v42 = vpop.f32.mrb[3].mxu1  ;;  %v241_v46 = vmul.f32 %v232_v25, %v184_v37  ;;  %v245_v47 = vmul.f32 %v232_v25, %v194_v38  ;;  %v259_v48 = vadd.f32 %v252_v34, %v239_v39  ;;  %v263_v49 = vadd.f32 %v252_v34, %v243_v40 }
  0xf5   :  { %209 = vst.msk [vmem:[#allocation2 + $0x8] sm:$0xff] %vm24_vm2, %v200_v35  ;;  %213 = vst.msk [vmem:[#allocation2 + $0x28] sm:$0xff] %vm24_vm2, %v204_v36  ;;  %v202_v44 = vadd.f32 %v186_v41, %v35_v32  ;;  %v206_v45 = vadd.f32 %v196_v42, %v39_v33 }
  0xf6   :  { %v261_v50 = vadd.f32 %v252_v34, %v241_v46  ;;  %v265_v51 = vadd.f32 %v252_v34, %v245_v47  ;;  %267 = vst [vmem:[#allocation3] sm:$0xff] %v259_v48  ;;  %271 = vst [vmem:[#allocation3 + $0x20] sm:$0xff] %v263_v49 }
  0xf7   :  { %211 = vst.msk [vmem:[#allocation2 + $0x18] sm:$0xff] %vm24_vm2, %v202_v44  ;;  %215 = vst.msk [vmem:[#allocation2 + $0x38] sm:$0xff] %vm24_vm2, %v206_v45 }
  0xf8   :  { %269 = vst [vmem:[#allocation3 + $0x10] sm:$0xff] %v261_v50  ;;  %273 = vst [vmem:[#allocation3 + $0x30] sm:$0xff] %v265_v51 }
  0xfc   :  { %v220_v54 = vld [vmem:[#allocation2 + $0x8] sm:$0xff] }
  0xfd   :  { %v224_v55 = vld [vmem:[#allocation2 + $0x28] sm:$0xff]  ;;  %v240_v56 = vmul.f32 %v236_v52, %v220_v54 }
  0xfe   :  { %v244_v57 = vmul.f32 %v236_v52, %v224_v55  ;;  %v222_v58 = vld [vmem:[#allocation2 + $0x18] sm:$0xff] }
  0xff   :  { %v226_v59 = vld [vmem:[#allocation2 + $0x38] sm:$0xff]  ;;  %v242_v60 = vmul.f32 %v236_v52, %v222_v58  ;;  %v260_v62 = vadd.f32 %v256_v53, %v240_v56 }
 0x100   :  { %v246_v61 = vmul.f32 %v236_v52, %v226_v59  ;;  %v264_v63 = vadd.f32 %v256_v53, %v244_v57 }
 0x101   :  { %v262_v0 = vadd.f32 %v256_v53, %v242_v60  ;;  %268 = vst.msk [vmem:[#allocation3 + $0x8] sm:$0xff] %vm24_vm2, %v260_v62 }
 0x102   :  { %v266_v1 = vadd.f32 %v256_v53, %v246_v61  ;;  %272 = vst.msk [vmem:[#allocation3 + $0x28] sm:$0xff] %vm24_vm2, %v264_v63 }
 0x103   :  { %270 = vst.msk [vmem:[#allocation3 + $0x18] sm:$0xff] %vm24_vm2, %v262_v0 }
 0x104   :  { %274 = vst.msk [vmem:[#allocation3 + $0x38] sm:$0xff] %vm24_vm2, %v266_v1 }
 0x105   :  { %362 = shalt.err (!%p359_p4)
}
 0x106   :  { %s363_s24 = scalar_lea.hbm %s484_s4, 1024 }
 0x107   :  { %p364_p5 = scmp.ne.s32.totalorder %s484_s4, %s363_s24  ;;  %p367_p6 = scmp.lt.u32.totalorder %s363_s24, %s484_s4 }
 0x109   :  { %p369_p7 = pnand %p367_p6, %p364_p5 }
 0x10b   :  { %372 = shalt.err (!%p369_p7)
}
 0x10c   :  { %s378_s29 = smov 256   ;;  %s379_s30 = smov 16  }
 0x10d   :  { %286 = dma.vmem_to_hbm [thread:$0]  %s281_s3, 1024, %s484_s4, [#allocation4], %s378_s29, %s378_s29, %s379_s30  }
 0x10e   :  { %373 = dma.done.wait [#allocation4], 1024  }
 0x10f   :  { %374 = vsyncadd [#allocation4], 4294966272 }
 0x110   :  { %290 = vsyncpa [#allocation4], 1 }

</bundles_post_ra>
